<compile_context>
chip_gen: v6e
topology: v6e:2x2x1
jax: 0.10.0
libtpu: 0.0.40
codegen_flags: <defaults>
</compile_context>

<pallas_src>
import math
from functools import partial

import jax
import jax.numpy as jnp
from jax.experimental import pallas as pl
from jax.experimental.pallas import tpu as pltpu

EPS = 1e-5
RATES = (6, 12, 18)


def _vmem_limit_bytes():
    # Per-generation scoped-VMEM budget: ~3/4 of physical, clamped.
    #   v5e/v6e (128 MiB physical) -> 96 MiB ; v7x (64 MiB per TC) -> 48 MiB.
    try:
        phys = int(pltpu.get_tpu_info().vmem_capacity_bytes)
    except Exception:
        phys = 64 * 1024 * 1024  # conservative fallback that fits every generation
    return min(max(phys * 3 // 4, 32 * 1024 * 1024), 100 * 1024 * 1024)


_VMEM_LIMIT = _vmem_limit_bytes()


# --------------------------------------------------------------------------------------
# Pass 1: dilated 3x3 conv (im2col matmul) + bias + ReLU + lane-dense per-tile BN partials
# --------------------------------------------------------------------------------------
def _branch_relu_stats_kernel(cols_ref, wbr_ref, bbr_ref,
                              y_ref, psum_ref, psq_ref, *, num_branches):
    """
    cols_ref : (nb, 9*Cin, TILE_P)  im2col columns for this pixel tile (one slab per branch)
    wbr_ref  : (nb, Cout, 9*Cin)    3x3 conv weights (constant index map -> resident in VMEM)
    bbr_ref  : (nb, Cout, 1)        conv biases (f32)
    y_ref    : (nb, Cout, TILE_P)   ReLU'd branch activations (storage dtype, bf16 by default)
    psum_ref : (1, nb, Cout)        per-tile per-channel sums        (f32, lane-dense rows)
    psq_ref  : (1, nb, Cout)        per-tile per-channel sum-squares (f32, lane-dense rows)
    """
    for br in range(num_branches):
        y = jnp.dot(wbr_ref[br], cols_ref[br], preferred_element_type=jnp.float32)
        y = jnp.maximum(y + bbr_ref[br], 0.0)                      # bias + ReLU (f32)
        y_st = y.astype(y_ref.dtype)
        y_ref[br] = y_st
        # Statistics from the stored-precision values -> pass-2 normalization is self-consistent.
        yf = y_st.astype(jnp.float32)
        psum_ref[0, br] = jnp.sum(yf, axis=1)                      # (Cout,) lane-dense row
        psq_ref[0, br] = jnp.sum(yf * yf, axis=1)


# --------------------------------------------------------------------------------------
# Pass 2: fused BN epilogue + single merged 1x1 output conv (K = nb*Cout, no concat/loop)
# --------------------------------------------------------------------------------------
def _bn_output_kernel(y_ref, scale_ref, shift_ref, wo_ref, bo_ref, out_ref):
    """
    y_ref     : (nb*Cout, TILE_P)   branch activations for this pixel tile
    scale_ref : (nb*Cout, 1)        gamma / sqrt(var + eps)
    shift_ref : (nb*Cout, 1)        beta - mean * scale
    wo_ref    : (Cout, nb*Cout)     1x1 output conv weight, merged K axis
    bo_ref    : (Cout, 1)           1x1 output conv bias
    out_ref   : (Cout, TILE_P)
    """
    yhat = y_ref[...].astype(jnp.float32) * scale_ref[...] + shift_ref[...]
    yhat = yhat.astype(wo_ref.dtype)
    out_ref[...] = (jnp.dot(wo_ref[...], yhat, preferred_element_type=jnp.float32)
                    + bo_ref[...])


# --------------------------------------------------------------------------------------
# Wrapper glue: layout conversion, im2col tap gather, tile picker, stat -> scale/shift fold
# --------------------------------------------------------------------------------------
def _im2col_dilated(xp_cnhw, rate, pmax, h, w):
    """xp_cnhw: (Cin, N, Hp, Wp) zero-padded by pmax (channel-first / pixel-lane layout).
    Returns (9*Cin, N*H*W) with K index = tap*Cin + cin (tap = kh*3 + kw)."""
    cin, n = xp_cnhw.shape[0], xp_cnhw.shape[1]
    taps = []
    for kh in range(3):
        for kw in range(3):
            h0 = pmax - rate + kh * rate
            w0 = pmax - rate + kw * rate
            taps.append(xp_cnhw[:, :, h0:h0 + h, w0:w0 + w])       # (Cin, N, H, W)
    col = jnp.stack(taps, axis=0)                                  # (9, Cin, N, H, W)
    return col.reshape(9 * cin, n * h * w)


def _pick_tile_p(nhw, per_lane_bytes, fixed_bytes, budget_bytes):
    """Largest multiple-of-128 divisor of nhw whose double-buffered blocks fit the VMEM budget,
    preferring an even number (>=2) of tiles so the 'parallel' grid axis splits evenly across
    v7x's two TensorCores (no effect on v5e/v6e)."""
    cands = [t for t in range(128, nhw + 1, 128)
             if nhw % t == 0 and fixed_bytes + per_lane_bytes * t <= budget_bytes]
    if not cands:
        return nhw                                                  # tiny shapes: one full block
    even = [t for t in cands if (nhw // t) >= 2 and (nhw // t) % 2 == 0]
    pool = even if even else cands
    return max(pool)


def _aspp_forward_impl(x, params, rates=RATES, tile_p=None, compute_dtype=jnp.bfloat16):
    """x: (N, Cin, H, W) float32 -> (N, Cout, H, W) float32."""
    n, cin, h, w = x.shape
    cout = params["w_conv"][0].shape[0]
    nb = len(rates)
    pmax = max(rates)
    nhw = n * h * w
    cd_bytes = jnp.dtype(compute_dtype).itemsize

    if tile_p is None:
        # Per-lane VMEM bytes per grid step (x2 for double buffering); pass 1 dominates.
        p1_lane = 2 * nb * 9 * cin * cd_bytes + 2 * nb * cout * cd_bytes
        p2_lane = 2 * nb * cout * cd_bytes + 2 * cout * 4
        fixed = (2 * nb * cout * 9 * cin * cd_bytes          # resident conv weights
                 + 2 * cout * nb * cout * cd_bytes            # resident 1x1 weights
                 + (1 << 20))                                  # biases / stats / compiler slack
        tile_p = _pick_tile_p(nhw, max(p1_lane, p2_lane), fixed, int(_VMEM_LIMIT * 0.8))
    assert nhw % tile_p == 0, (nhw, tile_p)
    # TODO(synk): masked tail handling (stats + store) if the pixel axis ever needs padding.
    ntiles = nhw // tile_p

    # Layout glue: pad once, channels first so pixels are lane-dense; gather dilated taps.
    # TODO(synk): move this tap gather in-kernel (halo DMA over the padded slab) for real sizes.
    xp = jnp.pad(x, ((0, 0), (0, 0), (pmax, pmax), (pmax, pmax)))
    xp = xp.transpose(1, 0, 2, 3)                                  # (Cin, N, Hp, Wp)
    cols = jnp.stack([_im2col_dilated(xp, r, pmax, h, w) for r in rates], axis=0)
    cols = cols.astype(compute_dtype)                              # (nb, 9*Cin, NHW)

    # Weight K-order must match cols K-order (tap-major, cin-minor).
    wbr = jnp.stack([wc.transpose(0, 2, 3, 1).reshape(cout, 9 * cin)
                     for wc in params["w_conv"]], axis=0).astype(compute_dtype)
    bbr = jnp.stack([bc.reshape(cout, 1) for bc in params["b_conv"]],
                    axis=0).astype(jnp.float32)

    cparams = pltpu.CompilerParams(dimension_semantics=("parallel",),
                                   vmem_limit_bytes=_VMEM_LIMIT)

    # ---- Pass 1: conv + ReLU + lane-dense partial BN stats, tiled & pipelined over pixels ----
    y_act, psum, psq = pl.pallas_call(
        partial(_branch_relu_stats_kernel, num_branches=nb),
        out_shape=(jax.ShapeDtypeStruct((nb, cout, nhw), compute_dtype),
                   jax.ShapeDtypeStruct((ntiles, nb, cout), jnp.float32),
                   jax.ShapeDtypeStruct((ntiles, nb, cout), jnp.float32)),
        grid=(ntiles,),
        in_specs=[pl.BlockSpec((nb, 9 * cin, tile_p), lambda t: (0, 0, t)),
                  pl.BlockSpec((nb, cout, 9 * cin), lambda t: (0, 0, 0)),
                  pl.BlockSpec((nb, cout, 1), lambda t: (0, 0, 0))],
        out_specs=(pl.BlockSpec((nb, cout, tile_p), lambda t: (0, 0, t)),
                   pl.BlockSpec((1, nb, cout), lambda t: (t, 0, 0)),
                   pl.BlockSpec((1, nb, cout), lambda t: (t, 0, 0))),
        compiler_params=cparams,
    )(cols, wbr, bbr)

    # ---- Glue between passes: batch statistics -> BN scale/shift vectors (f32) --------------
    # TODO(synk): E[x^2]-E[x]^2 in f32 can cancel for very large N*H*W; use Welford partials.
    mean = jnp.sum(psum, axis=0) / nhw                             # (nb, Cout)
    var = jnp.maximum(jnp.sum(psq, axis=0) / nhw - mean * mean, 0.0)
    gamma = jnp.stack(params["bn_gamma"], axis=0)                  # (nb, Cout)
    beta = jnp.stack(params["bn_beta"], axis=0)
    s = gamma / jnp.sqrt(var + EPS)
    scale = s.reshape(nb * cout, 1)
    shift = (beta - mean * s).reshape(nb * cout, 1)

    # Merged-K 1x1 output conv operands (concat replaced by one big matmul; K = nb*Cout).
    wo = params["w_out"].reshape(cout, nb * cout).astype(compute_dtype)
    bo = params["b_out"].reshape(cout, 1).astype(jnp.float32)
    y2 = y_act.reshape(nb * cout, nhw)                             # contiguous, no-copy reshape

    # ---- Pass 2: BN apply + single merged 1x1 conv, tiled & pipelined over pixels ------------
    out_flat = pl.pallas_call(
        _bn_output_kernel,
        out_shape=jax.ShapeDtypeStruct((cout, nhw), jnp.float32),
        grid=(ntiles,),
        in_specs=[pl.BlockSpec((nb * cout, tile_p), lambda t: (0, t)),
                  pl.BlockSpec((nb * cout, 1), lambda t: (0, 0)),
                  pl.BlockSpec((nb * cout, 1), lambda t: (0, 0)),
                  pl.BlockSpec((cout, nb * cout), lambda t: (0, 0)),
                  pl.BlockSpec((cout, 1), lambda t: (0, 0))],
        out_specs=pl.BlockSpec((cout, tile_p), lambda t: (0, t)),
        compiler_params=cparams,
    )(y2, scale, shift, wo, bo)

    # Layout glue back to NCHW. Consumers that can take (Cout, N*H*W) should use out_flat
    # directly and skip this extra HBM pass (review item 12).
    return out_flat.reshape(cout, n, h, w).transpose(1, 0, 2, 3)


aspp_forward = jax.jit(_aspp_forward_impl,
                       static_argnames=("rates", "tile_p", "compute_dtype"))


# --------------------------------------------------------------------------------------
# Parameter init (matches ASPP.__init__/_init_weights shapes) and pure-JAX reference
# --------------------------------------------------------------------------------------
def init_params(key, cin, cout, rates=RATES):
    keys = jax.random.split(key, 2 * len(rates) + 2)
    w_conv, b_conv, gammas, betas = [], [], [], []
    for i, _ in enumerate(rates):
        fan_in = cin * 3 * 3
        std = math.sqrt(2.0 / fan_in)
        w_conv.append(std * jax.random.normal(keys[2 * i], (cout, cin, 3, 3), jnp.float32))
        bound = 1.0 / math.sqrt(fan_in)
        b_conv.append(jax.random.uniform(keys[2 * i + 1], (cout,), jnp.float32, -bound, bound))
        gammas.append(jnp.ones((cout,), jnp.float32))
        betas.append(jnp.zeros((cout,), jnp.float32))
    fan_in_o = len(rates) * cout
    std_o = math.sqrt(2.0 / fan_in_o)
    w_out = std_o * jax.random.normal(keys[-2], (cout, fan_in_o, 1, 1), jnp.float32)
    bound_o = 1.0 / math.sqrt(fan_in_o)
    b_out = jax.random.uniform(keys[-1], (cout,), jnp.float32, -bound_o, bound_o)
    return dict(w_conv=w_conv, b_conv=b_conv, bn_gamma=gammas, bn_beta=betas,
                w_out=w_out, b_out=b_out)


def aspp_reference(x, params, rates=RATES):
    outs = []
    for i, r in enumerate(rates):
        y = jax.lax.conv_general_dilated(
            x, params["w_conv"][i], window_strides=(1, 1),
            padding=[(r, r), (r, r)], rhs_dilation=(r, r),
            dimension_numbers=("NCHW", "OIHW", "NCHW"),
            precision=jax.lax.Precision.HIGHEST)
        y = y + params["b_conv"][i][None, :, None, None]
        y = jnp.maximum(y, 0.0)
        mean = jnp.mean(y, axis=(0, 2, 3), keepdims=True)
        var = jnp.mean(jnp.square(y - mean), axis=(0, 2, 3), keepdims=True)
        yhat = (y - mean) / jnp.sqrt(var + EPS)
        outs.append(yhat * params["bn_gamma"][i][None, :, None, None]
                    + params["bn_beta"][i][None, :, None, None])
    cat = jnp.concatenate(outs, axis=1)
    out = jax.lax.conv_general_dilated(
        cat, params["w_out"], window_strides=(1, 1), padding=[(0, 0), (0, 0)],
        dimension_numbers=("NCHW", "OIHW", "NCHW"),
        precision=jax.lax.Precision.HIGHEST)
    return out + params["b_out"][None, :, None, None]


if __name__ == "__main__":
    N, Cin, Cout, H, W = 2, 4, 8, 16, 16
    key = jax.random.PRNGKey(0)
    kx, kp = jax.random.split(key)
    x = jax.random.normal(kx, (N, Cin, H, W), jnp.float32)
    params = init_params(kp, Cin, Cout)

    ref = aspp_reference(x, params)

    # Exact-precision path: tight element-wise check against the pure-JAX reference.
    out_f32 = jax.block_until_ready(aspp_forward(x, params, compute_dtype=jnp.float32))
    assert out_f32.shape == (N, Cout, H, W), out_f32.shape
    err32 = float(jnp.max(jnp.abs(out_f32 - ref)))
    if not bool(jnp.allclose(out_f32, ref, atol=5e-3, rtol=5e-3)):
        raise AssertionError(f"f32 Pallas ASPP mismatch vs reference, max abs err = {err32}")

    # Default bf16 fast path (halved HBM streams, native MXU dtype): relative-L2 check.
    out_bf16 = jax.block_until_ready(aspp_forward(x, params))
    assert out_bf16.shape == (N, Cout, H, W), out_bf16.shape
    rel_l2 = float(jnp.linalg.norm(out_bf16 - ref) / (jnp.linalg.norm(ref) + 1e-12))
    if rel_l2 > 3e-2:
        raise AssertionError(f"bf16 Pallas ASPP mismatch vs reference, rel L2 err = {rel_l2}")

    print("KERNEL_OK")
</pallas_src>

<mosaic_0001>
module attributes {stable_mosaic.version = 11 : i64} {
  func.func @_branch_relu_stats_kernel(%arg0: i32, %arg1: memref<3x36x256xf32, #tpu.memory_space<vmem>>, %arg2: memref<3x8x36xf32, #tpu.memory_space<vmem>>, %arg3: memref<3x8x1xf32, #tpu.memory_space<vmem>>, %arg4: memref<3x8x256xf32, #tpu.memory_space<vmem>>, %arg5: memref<1x3x8xf32, #tpu.memory_space<vmem>>, %arg6: memref<1x3x8xf32, #tpu.memory_space<vmem>>) attributes {dimension_semantics = [#tpu.dimension_semantics<parallel>], iteration_bounds = array<i64: 2>, scalar_prefetch = 0 : i64, scratch_operands = 0 : i64, tpu.core_type = #tpu.core_type<tc>, window_params = [{transform_indices = @transform_0, window_bounds = array<i64: 3, 36, 256>}, {pipeline_mode = #tpu.pipeline_mode<synchronous>, transform_indices = @transform_1, window_bounds = array<i64: 3, 8, 36>}, {pipeline_mode = #tpu.pipeline_mode<synchronous>, transform_indices = @transform_2, window_bounds = array<i64: 3, 8, 1>}, {transform_indices = @transform_3, window_bounds = array<i64: 3, 8, 256>}, {transform_indices = @transform_4, window_bounds = array<i64: 1, 3, 8>}, {transform_indices = @transform_5, window_bounds = array<i64: 1, 3, 8>}]} {
    %c0 = arith.constant 0 : index
    %c0_0 = arith.constant 0 : index
    %c0_1 = arith.constant 0 : index
    %0 = vector.load %arg2[%c0, %c0_0, %c0_1] : memref<3x8x36xf32, #tpu.memory_space<vmem>>, vector<1x8x36xf32>
    %1 = vector.shape_cast %0 : vector<1x8x36xf32> to vector<8x36xf32>
    %c0_2 = arith.constant 0 : index
    %c0_3 = arith.constant 0 : index
    %c0_4 = arith.constant 0 : index
    %2 = vector.load %arg1[%c0_2, %c0_3, %c0_4] : memref<3x36x256xf32, #tpu.memory_space<vmem>>, vector<1x36x256xf32>
    %3 = vector.shape_cast %2 : vector<1x36x256xf32> to vector<36x256xf32>
    %cst = arith.constant dense<0.000000e+00> : vector<8x256xf32>
    %4 = tpu.matmul %1, %3, %cst {dimension_numbers = #tpu.dot_dimension_numbers<[1], [0], [0], [1], [0, 0, 1, 1], [], []>} : vector<8x36xf32>, vector<36x256xf32>, vector<8x256xf32> -> vector<8x256xf32>
    %c0_5 = arith.constant 0 : index
    %c0_6 = arith.constant 0 : index
    %c0_7 = arith.constant 0 : index
    %5 = vector.load %arg3[%c0_5, %c0_6, %c0_7] : memref<3x8x1xf32, #tpu.memory_space<vmem>>, vector<1x8x1xf32>
    %6 = vector.shape_cast %5 : vector<1x8x1xf32> to vector<8x1xf32>
    %7 = vector.broadcast %6 : vector<8x1xf32> to vector<8x256xf32>
    %8 = arith.addf %4, %7 : vector<8x256xf32>
    %cst_8 = arith.constant 0.000000e+00 : f32
    %9 = vector.broadcast %cst_8 : f32 to vector<8x256xf32>
    %10 = arith.maximumf %8, %9 : vector<8x256xf32>
    %c0_9 = arith.constant 0 : index
    %c0_10 = arith.constant 0 : index
    %c0_11 = arith.constant 0 : index
    %11 = vector.load %arg4[%c0_9, %c0_10, %c0_11] : memref<3x8x256xf32, #tpu.memory_space<vmem>>, vector<1x8x256xf32>
    %12 = vector.shape_cast %11 : vector<1x8x256xf32> to vector<8x256xf32>
    %13 = vector.shape_cast %10 : vector<8x256xf32> to vector<1x8x256xf32>
    tpu.vector_store %arg4[%c0_9, %c0_10, %c0_11], %13 {strides = array<i32>} : memref<3x8x256xf32, #tpu.memory_space<vmem>>, vector<1x8x256xf32>,
    %cst_12 = arith.constant dense<0.000000e+00> : vector<8xf32>
    %14 = vector.multi_reduction <add>, %10, %cst_12 [1] : vector<8x256xf32> to vector<8xf32>
    %c0_13 = arith.constant 0 : index
    %c0_14 = arith.constant 0 : index
    %c0_15 = arith.constant 0 : index
    %15 = vector.load %arg5[%c0_13, %c0_14, %c0_15] : memref<1x3x8xf32, #tpu.memory_space<vmem>>, vector<1x1x8xf32>
    %16 = vector.shape_cast %15 : vector<1x1x8xf32> to vector<8xf32>
    %17 = vector.shape_cast %14 : vector<8xf32> to vector<1x1x8xf32>
    tpu.vector_store %arg5[%c0_13, %c0_14, %c0_15], %17 {strides = array<i32>} : memref<1x3x8xf32, #tpu.memory_space<vmem>>, vector<1x1x8xf32>,
    %18 = arith.mulf %10, %10 : vector<8x256xf32>
    %cst_16 = arith.constant dense<0.000000e+00> : vector<8xf32>
    %19 = vector.multi_reduction <add>, %18, %cst_16 [1] : vector<8x256xf32> to vector<8xf32>
    %c0_17 = arith.constant 0 : index
    %c0_18 = arith.constant 0 : index
    %c0_19 = arith.constant 0 : index
    %20 = vector.load %arg6[%c0_17, %c0_18, %c0_19] : memref<1x3x8xf32, #tpu.memory_space<vmem>>, vector<1x1x8xf32>
    %21 = vector.shape_cast %20 : vector<1x1x8xf32> to vector<8xf32>
    %22 = vector.shape_cast %19 : vector<8xf32> to vector<1x1x8xf32>
    tpu.vector_store %arg6[%c0_17, %c0_18, %c0_19], %22 {strides = array<i32>} : memref<1x3x8xf32, #tpu.memory_space<vmem>>, vector<1x1x8xf32>,
    %c1 = arith.constant 1 : index
    %c0_20 = arith.constant 0 : index
    %c0_21 = arith.constant 0 : index
    %23 = vector.load %arg2[%c1, %c0_20, %c0_21] : memref<3x8x36xf32, #tpu.memory_space<vmem>>, vector<1x8x36xf32>
    %24 = vector.shape_cast %23 : vector<1x8x36xf32> to vector<8x36xf32>
    %c1_22 = arith.constant 1 : index
    %c0_23 = arith.constant 0 : index
    %c0_24 = arith.constant 0 : index
    %25 = vector.load %arg1[%c1_22, %c0_23, %c0_24] : memref<3x36x256xf32, #tpu.memory_space<vmem>>, vector<1x36x256xf32>
    %26 = vector.shape_cast %25 : vector<1x36x256xf32> to vector<36x256xf32>
    %cst_25 = arith.constant dense<0.000000e+00> : vector<8x256xf32>
    %27 = tpu.matmul %24, %26, %cst_25 {dimension_numbers = #tpu.dot_dimension_numbers<[1], [0], [0], [1], [0, 0, 1, 1], [], []>} : vector<8x36xf32>, vector<36x256xf32>, vector<8x256xf32> -> vector<8x256xf32>
    %c1_26 = arith.constant 1 : index
    %c0_27 = arith.constant 0 : index
    %c0_28 = arith.constant 0 : index
    %28 = vector.load %arg3[%c1_26, %c0_27, %c0_28] : memref<3x8x1xf32, #tpu.memory_space<vmem>>, vector<1x8x1xf32>
    %29 = vector.shape_cast %28 : vector<1x8x1xf32> to vector<8x1xf32>
    %30 = vector.broadcast %29 : vector<8x1xf32> to vector<8x256xf32>
    %31 = arith.addf %27, %30 : vector<8x256xf32>
    %cst_29 = arith.constant 0.000000e+00 : f32
    %32 = vector.broadcast %cst_29 : f32 to vector<8x256xf32>
    %33 = arith.maximumf %31, %32 : vector<8x256xf32>
    %c1_30 = arith.constant 1 : index
    %c0_31 = arith.constant 0 : index
    %c0_32 = arith.constant 0 : index
    %34 = vector.load %arg4[%c1_30, %c0_31, %c0_32] : memref<3x8x256xf32, #tpu.memory_space<vmem>>, vector<1x8x256xf32>
    %35 = vector.shape_cast %34 : vector<1x8x256xf32> to vector<8x256xf32>
    %36 = vector.shape_cast %33 : vector<8x256xf32> to vector<1x8x256xf32>
    tpu.vector_store %arg4[%c1_30, %c0_31, %c0_32], %36 {strides = array<i32>} : memref<3x8x256xf32, #tpu.memory_space<vmem>>, vector<1x8x256xf32>,
    %cst_33 = arith.constant dense<0.000000e+00> : vector<8xf32>
    %37 = vector.multi_reduction <add>, %33, %cst_33 [1] : vector<8x256xf32> to vector<8xf32>
    %c0_34 = arith.constant 0 : index
    %c1_35 = arith.constant 1 : index
    %c0_36 = arith.constant 0 : index
    %38 = vector.load %arg5[%c0_34, %c1_35, %c0_36] : memref<1x3x8xf32, #tpu.memory_space<vmem>>, vector<1x1x8xf32>
    %39 = vector.shape_cast %38 : vector<1x1x8xf32> to vector<8xf32>
    %40 = vector.shape_cast %37 : vector<8xf32> to vector<1x1x8xf32>
    tpu.vector_store %arg5[%c0_34, %c1_35, %c0_36], %40 {strides = array<i32>} : memref<1x3x8xf32, #tpu.memory_space<vmem>>, vector<1x1x8xf32>,
    %41 = arith.mulf %33, %33 : vector<8x256xf32>
    %cst_37 = arith.constant dense<0.000000e+00> : vector<8xf32>
    %42 = vector.multi_reduction <add>, %41, %cst_37 [1] : vector<8x256xf32> to vector<8xf32>
    %c0_38 = arith.constant 0 : index
    %c1_39 = arith.constant 1 : index
    %c0_40 = arith.constant 0 : index
    %43 = vector.load %arg6[%c0_38, %c1_39, %c0_40] : memref<1x3x8xf32, #tpu.memory_space<vmem>>, vector<1x1x8xf32>
    %44 = vector.shape_cast %43 : vector<1x1x8xf32> to vector<8xf32>
    %45 = vector.shape_cast %42 : vector<8xf32> to vector<1x1x8xf32>
    tpu.vector_store %arg6[%c0_38, %c1_39, %c0_40], %45 {strides = array<i32>} : memref<1x3x8xf32, #tpu.memory_space<vmem>>, vector<1x1x8xf32>,
    %c2 = arith.constant 2 : index
    %c0_41 = arith.constant 0 : index
    %c0_42 = arith.constant 0 : index
    %46 = vector.load %arg2[%c2, %c0_41, %c0_42] : memref<3x8x36xf32, #tpu.memory_space<vmem>>, vector<1x8x36xf32>
    %47 = vector.shape_cast %46 : vector<1x8x36xf32> to vector<8x36xf32>
    %c2_43 = arith.constant 2 : index
    %c0_44 = arith.constant 0 : index
    %c0_45 = arith.constant 0 : index
    %48 = vector.load %arg1[%c2_43, %c0_44, %c0_45] : memref<3x36x256xf32, #tpu.memory_space<vmem>>, vector<1x36x256xf32>
    %49 = vector.shape_cast %48 : vector<1x36x256xf32> to vector<36x256xf32>
    %cst_46 = arith.constant dense<0.000000e+00> : vector<8x256xf32>
    %50 = tpu.matmul %47, %49, %cst_46 {dimension_numbers = #tpu.dot_dimension_numbers<[1], [0], [0], [1], [0, 0, 1, 1], [], []>} : vector<8x36xf32>, vector<36x256xf32>, vector<8x256xf32> -> vector<8x256xf32>
    %c2_47 = arith.constant 2 : index
    %c0_48 = arith.constant 0 : index
    %c0_49 = arith.constant 0 : index
    %51 = vector.load %arg3[%c2_47, %c0_48, %c0_49] : memref<3x8x1xf32, #tpu.memory_space<vmem>>, vector<1x8x1xf32>
    %52 = vector.shape_cast %51 : vector<1x8x1xf32> to vector<8x1xf32>
    %53 = vector.broadcast %52 : vector<8x1xf32> to vector<8x256xf32>
    %54 = arith.addf %50, %53 : vector<8x256xf32>
    %cst_50 = arith.constant 0.000000e+00 : f32
    %55 = vector.broadcast %cst_50 : f32 to vector<8x256xf32>
    %56 = arith.maximumf %54, %55 : vector<8x256xf32>
    %c2_51 = arith.constant 2 : index
    %c0_52 = arith.constant 0 : index
    %c0_53 = arith.constant 0 : index
    %57 = vector.load %arg4[%c2_51, %c0_52, %c0_53] : memref<3x8x256xf32, #tpu.memory_space<vmem>>, vector<1x8x256xf32>
    %58 = vector.shape_cast %57 : vector<1x8x256xf32> to vector<8x256xf32>
    %59 = vector.shape_cast %56 : vector<8x256xf32> to vector<1x8x256xf32>
    tpu.vector_store %arg4[%c2_51, %c0_52, %c0_53], %59 {strides = array<i32>} : memref<3x8x256xf32, #tpu.memory_space<vmem>>, vector<1x8x256xf32>,
    %cst_54 = arith.constant dense<0.000000e+00> : vector<8xf32>
    %60 = vector.multi_reduction <add>, %56, %cst_54 [1] : vector<8x256xf32> to vector<8xf32>
    %c0_55 = arith.constant 0 : index
    %c2_56 = arith.constant 2 : index
    %c0_57 = arith.constant 0 : index
    %61 = vector.load %arg5[%c0_55, %c2_56, %c0_57] : memref<1x3x8xf32, #tpu.memory_space<vmem>>, vector<1x1x8xf32>
    %62 = vector.shape_cast %61 : vector<1x1x8xf32> to vector<8xf32>
    %63 = vector.shape_cast %60 : vector<8xf32> to vector<1x1x8xf32>
    tpu.vector_store %arg5[%c0_55, %c2_56, %c0_57], %63 {strides = array<i32>} : memref<1x3x8xf32, #tpu.memory_space<vmem>>, vector<1x1x8xf32>,
    %64 = arith.mulf %56, %56 : vector<8x256xf32>
    %cst_58 = arith.constant dense<0.000000e+00> : vector<8xf32>
    %65 = vector.multi_reduction <add>, %64, %cst_58 [1] : vector<8x256xf32> to vector<8xf32>
    %c0_59 = arith.constant 0 : index
    %c2_60 = arith.constant 2 : index
    %c0_61 = arith.constant 0 : index
    %66 = vector.load %arg6[%c0_59, %c2_60, %c0_61] : memref<1x3x8xf32, #tpu.memory_space<vmem>>, vector<1x1x8xf32>
    %67 = vector.shape_cast %66 : vector<1x1x8xf32> to vector<8xf32>
    %68 = vector.shape_cast %65 : vector<8xf32> to vector<1x1x8xf32>
    tpu.vector_store %arg6[%c0_59, %c2_60, %c0_61], %68 {strides = array<i32>} : memref<1x3x8xf32, #tpu.memory_space<vmem>>, vector<1x1x8xf32>,
    return
  }
  func.func @transform_0(%arg0: i32) -> (i32, i32, i32) {
    %c0_i32 = arith.constant 0 : i32
    %c0_i32_0 = arith.constant 0 : i32
    %c0_i32_1 = arith.constant 0 : i32
    return %c0_i32, %c0_i32_0, %arg0 : i32, i32, i32
  }
  func.func @transform_1(%arg0: i32) -> (i32, i32, i32) {
    %c0_i32 = arith.constant 0 : i32
    %c0_i32_0 = arith.constant 0 : i32
    %c0_i32_1 = arith.constant 0 : i32
    %c0_i32_2 = arith.constant 0 : i32
    return %c0_i32, %c0_i32_0, %c0_i32_1 : i32, i32, i32
  }
  func.func @transform_2(%arg0: i32) -> (i32, i32, i32) {
    %c0_i32 = arith.constant 0 : i32
    %c0_i32_0 = arith.constant 0 : i32
    %c0_i32_1 = arith.constant 0 : i32
    %c0_i32_2 = arith.constant 0 : i32
    return %c0_i32, %c0_i32_0, %c0_i32_1 : i32, i32, i32
  }
  func.func @transform_3(%arg0: i32) -> (i32, i32, i32) {
    %c0_i32 = arith.constant 0 : i32
    %c0_i32_0 = arith.constant 0 : i32
    %c0_i32_1 = arith.constant 0 : i32
    return %c0_i32, %c0_i32_0, %arg0 : i32, i32, i32
  }
  func.func @transform_4(%arg0: i32) -> (i32, i32, i32) {
    %c0_i32 = arith.constant 0 : i32
    %c0_i32_0 = arith.constant 0 : i32
    %c0_i32_1 = arith.constant 0 : i32
    return %arg0, %c0_i32, %c0_i32_0 : i32, i32, i32
  }
  func.func @transform_5(%arg0: i32) -> (i32, i32, i32) {
    %c0_i32 = arith.constant 0 : i32
    %c0_i32_0 = arith.constant 0 : i32
    %c0_i32_1 = arith.constant 0 : i32
    return %arg0, %c0_i32, %c0_i32_0 : i32, i32, i32
  }
}

module attributes {stable_mosaic.version = 11 : i64} {
  func.func @_bn_output_kernel(%arg0: i32, %arg1: memref<24x256xf32, #tpu.memory_space<vmem>>, %arg2: memref<24x1xf32, #tpu.memory_space<vmem>>, %arg3: memref<24x1xf32, #tpu.memory_space<vmem>>, %arg4: memref<8x24xf32, #tpu.memory_space<vmem>>, %arg5: memref<8x1xf32, #tpu.memory_space<vmem>>, %arg6: memref<8x256xf32, #tpu.memory_space<vmem>>) attributes {dimension_semantics = [#tpu.dimension_semantics<parallel>], iteration_bounds = array<i64: 2>, scalar_prefetch = 0 : i64, scratch_operands = 0 : i64, tpu.core_type = #tpu.core_type<tc>, window_params = [{transform_indices = @transform_0, window_bounds = array<i64: 24, 256>}, {pipeline_mode = #tpu.pipeline_mode<synchronous>, transform_indices = @transform_1, window_bounds = array<i64: 24, 1>}, {pipeline_mode = #tpu.pipeline_mode<synchronous>, transform_indices = @transform_2, window_bounds = array<i64: 24, 1>}, {pipeline_mode = #tpu.pipeline_mode<synchronous>, transform_indices = @transform_3, window_bounds = array<i64: 8, 24>}, {pipeline_mode = #tpu.pipeline_mode<synchronous>, transform_indices = @transform_4, window_bounds = array<i64: 8, 1>}, {transform_indices = @transform_5, window_bounds = array<i64: 8, 256>}]} {
    %c0 = arith.constant 0 : index
    %c0_0 = arith.constant 0 : index
    %0 = vector.load %arg1[%c0, %c0_0] : memref<24x256xf32, #tpu.memory_space<vmem>>, vector<24x256xf32>
    %c0_1 = arith.constant 0 : index
    %c0_2 = arith.constant 0 : index
    %1 = vector.load %arg2[%c0_1, %c0_2] : memref<24x1xf32, #tpu.memory_space<vmem>>, vector<24x1xf32>
    %2 = vector.broadcast %1 : vector<24x1xf32> to vector<24x256xf32>
    %3 = arith.mulf %0, %2 : vector<24x256xf32>
    %c0_3 = arith.constant 0 : index
    %c0_4 = arith.constant 0 : index
    %4 = vector.load %arg3[%c0_3, %c0_4] : memref<24x1xf32, #tpu.memory_space<vmem>>, vector<24x1xf32>
    %5 = vector.broadcast %4 : vector<24x1xf32> to vector<24x256xf32>
    %6 = arith.addf %3, %5 : vector<24x256xf32>
    %c0_5 = arith.constant 0 : index
    %c0_6 = arith.constant 0 : index
    %7 = vector.load %arg4[%c0_5, %c0_6] : memref<8x24xf32, #tpu.memory_space<vmem>>, vector<8x24xf32>
    %cst = arith.constant dense<0.000000e+00> : vector<8x256xf32>
    %8 = tpu.matmul %7, %6, %cst {dimension_numbers = #tpu.dot_dimension_numbers<[1], [0], [0], [1], [0, 0, 1, 1], [], []>} : vector<8x24xf32>, vector<24x256xf32>, vector<8x256xf32> -> vector<8x256xf32>
    %c0_7 = arith.constant 0 : index
    %c0_8 = arith.constant 0 : index
    %9 = vector.load %arg5[%c0_7, %c0_8] : memref<8x1xf32, #tpu.memory_space<vmem>>, vector<8x1xf32>
    %10 = vector.broadcast %9 : vector<8x1xf32> to vector<8x256xf32>
    %11 = arith.addf %8, %10 : vector<8x256xf32>
    %c0_9 = arith.constant 0 : index
    %c0_10 = arith.constant 0 : index
    %12 = vector.load %arg6[%c0_9, %c0_10] : memref<8x256xf32, #tpu.memory_space<vmem>>, vector<8x256xf32>
    tpu.vector_store %arg6[%c0_9, %c0_10], %11 {strides = array<i32>} : memref<8x256xf32, #tpu.memory_space<vmem>>, vector<8x256xf32>,
    return
  }
  func.func @transform_0(%arg0: i32) -> (i32, i32) {
    %c0_i32 = arith.constant 0 : i32
    %c0_i32_0 = arith.constant 0 : i32
    return %c0_i32, %arg0 : i32, i32
  }
  func.func @transform_1(%arg0: i32) -> (i32, i32) {
    %c0_i32 = arith.constant 0 : i32
    %c0_i32_0 = arith.constant 0 : i32
    %c0_i32_1 = arith.constant 0 : i32
    return %c0_i32, %c0_i32_0 : i32, i32
  }
  func.func @transform_2(%arg0: i32) -> (i32, i32) {
    %c0_i32 = arith.constant 0 : i32
    %c0_i32_0 = arith.constant 0 : i32
    %c0_i32_1 = arith.constant 0 : i32
    return %c0_i32, %c0_i32_0 : i32, i32
  }
  func.func @transform_3(%arg0: i32) -> (i32, i32) {
    %c0_i32 = arith.constant 0 : i32
    %c0_i32_0 = arith.constant 0 : i32
    %c0_i32_1 = arith.constant 0 : i32
    return %c0_i32, %c0_i32_0 : i32, i32
  }
  func.func @transform_4(%arg0: i32) -> (i32, i32) {
    %c0_i32 = arith.constant 0 : i32
    %c0_i32_0 = arith.constant 0 : i32
    %c0_i32_1 = arith.constant 0 : i32
    return %c0_i32, %c0_i32_0 : i32, i32
  }
  func.func @transform_5(%arg0: i32) -> (i32, i32) {
    %c0_i32 = arith.constant 0 : i32
    %c0_i32_0 = arith.constant 0 : i32
    return %c0_i32, %arg0 : i32, i32
  }
}

</mosaic_0001>

<bundles_post_ra>
// kernel: mul.17
= control target key start
LH: loop header
LB: loop body
LE: loop exit
PB: predicated region body
PF: predicated region fallthrough
CT: control target
= control target key end

     0   :  { %s34_s0 = inlined_call_operand.vmem [shape: f32[24,1], index: 0, kind: input, shape index: {}, may-alias: {0,1}]   ;;  %s35_s1 = inlined_call_operand.vmem [shape: f32[24,1], index: 1, kind: input, shape index: {}, may-alias: {0,1}]   ;;  %s36_s2 = inlined_call_operand.vmem [shape: f32[24,1], index: 2, kind: output, shape index: {}]  }
   0x1   :  { %v3_v0 = vld [vmem:[%s34_s0] sm:$0x1] }
   0x2   :  { %v4_v1 = vld [vmem:[%s35_s1] sm:$0x1] }
   0x3   :  { %v7_v2 = vmul.f32 %v4_v1, %v3_v0 }
   0x5   :  { %9 = vst [vmem:[%s36_s2] sm:$0x1] %v7_v2 }

// kernel: _aspp_forward_impl.3
= control target key start
LH: loop header
LB: loop body
LE: loop exit
PB: predicated region body
PF: predicated region fallthrough
CT: control target
= control target key end

     0   :  { %s556_s18 = smov 0   ;;  %s558_s19 = smov 0   ;;  %s632_s0 = inlined_call_operand.vmem [shape: f32[24,512], index: 0, kind: input, shape index: {}]   ;;  %s633_s1 = inlined_call_operand.vmem [shape: f32[24,1], index: 1, kind: input, shape index: {}]   ;;  %s634_s2 = inlined_call_operand.vmem [shape: f32[24,1], index: 2, kind: input, shape index: {}]   ;;  %s635_s3 = inlined_call_operand.vmem [shape: f32[8,24], index: 3, kind: input, shape index: {}]   ;;  %s636_s4 = inlined_call_operand.vmem [shape: f32[8,1], index: 4, kind: input, shape index: {}]   ;;  %s637_s5 = inlined_call_operand.vmem [shape: f32[8,512], index: 5, kind: output, shape index: {}]  }
   0x1   :  { %s560_s20 = smov 0  }
   0x2 LB: > { %s457_s21 = sadd.s32 4294967295, %s522_s20   ;;  %s573_s22 = sadd.s32 1, %s522_s20   ;;  %s522_s20 = sphi %s560_s20, %s640_s20   ;;  %s518_s19 = sphi %s558_s19, %s639_s19   ;;  %s514_s18 = sphi %s556_s18, %s638_s18  }
   0x3   : > { %s19_s23 = ssub.s32 %s522_s20, %s573_s22  ;;  %s22_s24 = sadd.s32 1, %s518_s19 }
   0x4   : > { %p20_p0 = scmp.eq.s32.totalorder %s19_s23, 0  ;;  %p29_p1 = scmp.ne.s32.totalorder %s518_s19, %s514_s18 }
   0x5   : > { %p30_p2 = scmp.eq.s32.totalorder %s522_s20, 0  ;;  %p460_p4 = scmp.ge.s32.totalorder %s522_s20, 2 }
   0x6   : > { %s582_s25 = scalar_select %p20_p0, %s518_s19, %s22_s24  }
   0x7   : > { %p31_p3 = por %p30_p2, %p29_p1  ;;  %177 = sbr.rel (%p460_p4) target bundleno = 19 (0x13), region = 32 }
   0xc   : > { %180 = sbr.rel (!%p31_p3) target bundleno = 19 (0x13), region = 36  ;;  %s182_s26 = sand.u32 (%p31_p3), 1, %s518_s19  }
   0xd   : > { %s469_s27 = sshll.u32 (%p31_p3), %s522_s20, 4  ;;  %s470_s28 = smul.u32 (%p31_p3), 48, %s182_s26 }
   0xe   : > { %s187_s6 = scalar_lea.vmem (%p31_p3), %s632_s0, %s469_s27 }
   0xf   : > { %v200_v0 = vld [vmem:[%s187_s6] sm:$0xff] (%p31_p3)  ;;  %v202_v1 = vld [vmem:[%s187_s6 + $0x8] sm:$0xff] (%p31_p3)  ;;  %s184_s7 = scalar_lea.vmem (%p31_p3), [#allocation2], %s470_s28 }
  0x10   : > { %v204_v2 = vld [vmem:[%s187_s6 + $0x20] sm:$0xff] (%p31_p3)  ;;  %v206_v3 = vld [vmem:[%s187_s6 + $0x28] sm:$0xff] (%p31_p3)  ;;  %201 = vst [vmem:[%s184_s7] sm:$0xff] (%p31_p3), %v200_v0  ;;  %203 = vst [vmem:[%s184_s7 + $0x8] sm:$0xff] (%p31_p3), %v202_v1 }
  0x11   : > { %v208_v4 = vld [vmem:[%s187_s6 + $0x40] sm:$0xff]  ;;  %v210_v5 = vld [vmem:[%s187_s6 + $0x48] sm:$0xff]  ;;  %205 = vst [vmem:[%s184_s7 + $0x10] sm:$0xff] %v204_v2  ;;  %207 = vst [vmem:[%s184_s7 + $0x18] sm:$0xff] %v206_v3 }
  0x12   : > { %209 = vst [vmem:[%s184_s7 + $0x20] sm:$0xff] %v208_v4  ;;  %211 = vst [vmem:[%s184_s7 + $0x28] sm:$0xff] %v210_v5 }
  0x13 PF: > { %p463_p5 = scmp.ge.s32.totalorder %s522_s20, 1  ;;  %p216_p6 = scmp.lt.s32.totalorder %s522_s20, 3 }
  0x15   : > { %p217_p7 = pnand %p463_p5, %p216_p6 }
  0x16   : > { %s223_s28 = sand.u32 (!%p217_p7), 1, %s514_s18   ;;  %s464_s7 = sshll.u32 (!%p217_p7), %s457_s21, 1 }
  0x17   : > { %220 = sbr.rel (%p217_p7) target bundleno = 366 (0x16e), region = 59  ;;  %p252_p8 = scmp.lt.s32.totalorder (!%p217_p7), %s464_s7, 3 }
  0x18   : > { %s471_s29 = smul.u32 (!%p217_p7), 48, %s223_s28 }
  0x1a   : > { %s225_s30 = scalar_lea.vmem (!%p217_p7), [#allocation2], %s471_s29 }
  0x1c   : > { %v289_v6 = vld [vmem:[%s634_s2 + $0x10] sm:$0xff]  ;;  %v524_v8 = vmov 0   ;;  %v264_v9 = vld [vmem:[%s633_s1 + $0x8] sm:$0xff]  ;;  %v263_v10 = vld [vmem:[%s633_s1] sm:$0xff]  ;;  %v525_v14 = vmov 0.0   ;;  %vm318_vm0 = vcmask 195584  }
  0x1d   : > { %v265_v7 = vld [vmem:[%s633_s1 + $0x10] sm:$0xff]  ;;  %499 = vset.pattern.permute.xlu1 %v524_v8  ;;  %498 = vset.pattern.permute.xlu0 %v524_v8  ;;  %v288_v11 = vld [vmem:[%s634_s2 + $0x8] sm:$0xff]  ;;  %v287_v12 = vld [vmem:[%s634_s2] sm:$0xff]  ;;  %s642_s7 = smov (!%p252_p8, %s464_s7), 3 }
  0x1e   : > { %302 = vperm.xlu1 %499, %v289_v6   ;;  %278 = vperm.xlu0 %498, %v265_v7   ;;  %v312_v13 = vld [vmem:[%s636_s4] sm:$0xff]  ;;  %v262_v16 = vld [vmem:[%s225_s30 + $0x28] sm:$0xff]  ;;  %v260_v25 = vld [vmem:[%s225_s30 + $0x18] sm:$0xff]  ;;  %s465_s8 = sshll.u32 %s642_s7, 3 }
  0x1f   : > { %386 = vmatprep.mubr.f32.mxu0 %v525_v14  ;;  %v261_v15 = vld [vmem:[%s225_s30 + $0x20] sm:$0xff]  ;;  %v259_v24 = vld [vmem:[%s225_s30 + $0x10] sm:$0xff]  ;;  %v258_v27 = vld [vmem:[%s225_s30 + $0x8] sm:$0xff]  ;;  %s255_s11 = scalar_lea.vmem %s637_s5, %s465_s8 }
  0x20   : > { %v257_v30 = vld [vmem:[%s225_s30] sm:$0xff] }
  0x21   : > { %v311_v39 = vld [vmem:[%s635_s3] sm:$0xff] }
  0x22   : > { %273 = vperm.xlu0 %498, %v264_v9   ;;  %268 = vperm.xlu1 %499, %v263_v10  }
  0x26   : > { %297 = vperm.xlu0 %498, %v288_v11   ;;  %292 = vperm.xlu1 %499, %v287_v12  }
  0x2a   : > { %315 = vperm.xlu0 %498, %v312_v13  }
  0x99   : > { %v303_v17 = vpop.permute.xlu1 %302  ;;  %v279_v18 = vpop.permute.xlu0 %278 }
  0x9a   : > { %v285_v19 = vmul.f32 %v279_v18, %v261_v15  ;;  %v286_v20 = vmul.f32 %v279_v18, %v262_v16 }
  0x9c   : > { %v310_v21 = vadd.f32 %v303_v17, %v286_v20  ;;  %v309_v22 = vadd.f32 %v303_v17, %v285_v19 }
  0x9d   : > { %v274_v23 = vpop.permute.xlu0 %273  ;;  %v269_v26 = vpop.permute.xlu1 %268 }
  0x9e   : > { %348 = vmatprep.subr.mxu0 %v310_v21  ;;  %v283_v28 = vmul.f32 %v274_v23, %v259_v24  ;;  %v284_v29 = vmul.f32 %v274_v23, %v260_v25  ;;  %v282_v33 = vmul.f32 %v269_v26, %v258_v27  ;;  %v281_v36 = vmul.f32 %v269_v26, %v257_v30 }
  0x9f   : > { %349 = vmatpush1.msra.mxu0 %v309_v22 }
  0xa1   : > { %v298_v31 = vpop.permute.xlu0 %297  ;;  %v293_v32 = vpop.permute.xlu1 %292 }
  0xa2   : > { %v307_v34 = vadd.f32 %v298_v31, %v283_v28  ;;  %v308_v35 = vadd.f32 %v298_v31, %v284_v29  ;;  %v306_v37 = vadd.f32 %v293_v32, %v282_v33  ;;  %v305_v38 = vadd.f32 %v293_v32, %v281_v36 }
  0xa4   : > { %350 = vmatprep.subr.mxu0 %v308_v35 }
  0xa5   : > { %351 = vmatpush1.msra.mxu0 %v307_v34  ;;  %v316_v40 = vpop.permute.xlu0 %315 }
  0xa6   : > { %352 = vmatprep.subr.mxu0 %v306_v37 }
  0xa7   : > { %353 = vmatpush1.msra.mxu0 %v305_v38 }
  0xa8   : > { %466 = vmatmul.mubr.msk.f32.vlgmr.msra.gmra.mxu0 %vm318_vm0, %v311_v39 }
 0x168   : > { %v388_v41 = vpop.f32.mrf.mxu0 }
 0x169   : > { %v389_v42 = vadd.f32 %v388_v41, %v316_v40 }
 0x16a   : > { %v390_v43 = vpop.f32.mrf.mxu0 }
 0x16b   : > { %393 = vst [vmem:[%s255_s11] sm:$0xff] %v389_v42  ;;  %v391_v44 = vadd.f32 %v390_v43, %v316_v40 }
 0x16d   : > { %394 = vst [vmem:[%s255_s11 + $0x8] sm:$0xff] %v391_v44 }
 0x16e PF: > { %p12_p9 = scmp.ge.s32.totalorder %s573_s22, 4   ;;  %s638_s18 = smov %s518_s19 }
 0x16f   : > { %s639_s19 = smov %s582_s25  ;;  %s640_s20 = smov %s573_s22 }
 0x170   :  { %14 = sbr.rel (!%p12_p9) target bundleno = 2 (0x2), region = 98 }

// kernel: _aspp_forward_impl.2
= control target key start
LH: loop header
LB: loop body
LE: loop exit
PB: predicated region body
PF: predicated region fallthrough
CT: control target
= control target key end

     0   :  { %s996_s18 = smov 0   ;;  %s998_s19 = smov 0   ;;  %s1211_s0 = inlined_call_operand.vmem [shape: f32[3,36,512], index: 0, kind: input, shape index: {}]   ;;  %s1212_s1 = inlined_call_operand.vmem [shape: f32[3,8,36], index: 1, kind: input, shape index: {}]   ;;  %s1213_s2 = inlined_call_operand.vmem [shape: f32[3,8,1], index: 2, kind: input, shape index: {}]   ;;  %s1214_s3 = inlined_call_operand.vmem [shape: f32[3,8,512], index: 3, kind: output, shape index: {0}]   ;;  %s1215_s4 = inlined_call_operand.vmem [shape: f32[2,3,8], index: 4, kind: output, shape index: {1}]   ;;  %s1216_s5 = inlined_call_operand.vmem [shape: f32[2,3,8], index: 5, kind: output, shape index: {2}]  }
   0x1   :  { %s1000_s20 = smov 0  }
   0x2 LB: > { %s1012_s21 = sadd.s32 4294967295, %s962_s20   ;;  %s1015_s22 = sadd.s32 1, %s962_s20   ;;  %s962_s20 = sphi %s1000_s20, %s1220_s20   ;;  %s958_s19 = sphi %s998_s19, %s1219_s19   ;;  %s954_s18 = sphi %s996_s18, %s1218_s18  }
   0x3   : > { %s20_s23 = ssub.s32 %s962_s20, %s1015_s22  ;;  %s23_s24 = sadd.s32 1, %s958_s19 }
   0x4   : > { %p21_p0 = scmp.eq.s32.totalorder %s20_s23, 0  ;;  %p30_p1 = scmp.ne.s32.totalorder %s958_s19, %s954_s18 }
   0x5   : > { %p31_p2 = scmp.eq.s32.totalorder %s962_s20, 0  ;;  %p102_p3 = scmp.eq.s32.totalorder %s1012_s21, 1 }
   0x6   : > { %s1025_s25 = scalar_select %p21_p0, %s958_s19, %s23_s24  }
   0x7   : > { %p32_p4 = por %p31_p2, %p30_p1  ;;  %p1027_p5 = por %p102_p3, %p30_p1 }
   0x8   : > { %p860_p6 = scmp.ge.s32.totalorder %s962_s20, 2 }
   0xa   : > { %182 = sbr.rel (%p860_p6) target bundleno = 34 (0x22), region = 24 }
   0xf   : > { %185 = sbr.rel (!%p32_p4) target bundleno = 34 (0x22), region = 28  ;;  %s187_s27 = sand.u32 (%p32_p4), 1, %s958_s19  }
  0x10   : > { %s907_s28 = sshll.u32 (%p32_p4), %s962_s20, 4  ;;  %s909_s29 = smul.u32 (%p32_p4), 240, %s187_s27 }
  0x11   : > { %s1037_s7 = scalar_lea.vmem (%p32_p4), %s1211_s0, %s907_s28 }
  0x12   : > { %v205_v0 = vld [vmem:[%s1037_s7] sm:$0xff] (%p32_p4)  ;;  %v207_v1 = vld [vmem:[%s1037_s7 + $0x8] sm:$0xff] (%p32_p4)  ;;  %s1045_s8 = scalar_lea.vmem (%p32_p4), [#allocation2], %s909_s29 }
  0x13   : > { %v209_v2 = vld [vmem:[%s1037_s7 + $0x20] sm:$0xff] (%p32_p4)  ;;  %v211_v3 = vld [vmem:[%s1037_s7 + $0x28] sm:$0xff] (%p32_p4)  ;;  %206 = vst [vmem:[%s1045_s8] sm:$0xff] (%p32_p4), %v205_v0  ;;  %208 = vst [vmem:[%s1045_s8 + $0x8] sm:$0xff] (%p32_p4), %v207_v1 }
  0x14   : > { %v213_v4 = vld [vmem:[%s1037_s7 + $0x40] sm:$0xff]  ;;  %v215_v5 = vld [vmem:[%s1037_s7 + $0x48] sm:$0xff]  ;;  %210 = vst [vmem:[%s1045_s8 + $0x10] sm:$0xff] %v209_v2  ;;  %212 = vst [vmem:[%s1045_s8 + $0x18] sm:$0xff] %v211_v3 }
  0x15   : > { %214 = vst [vmem:[%s1045_s8 + $0x20] sm:$0xff] %v213_v4  ;;  %216 = vst [vmem:[%s1045_s8 + $0x28] sm:$0xff] %v215_v5  ;;  %v217_v6 = vld [vmem:[%s1037_s7 + $0x60] sm:$0xff]  ;;  %v219_v7 = vld [vmem:[%s1037_s7 + $0x68] sm:$0xff] }
  0x16   : > { %v221_v8 = vld [vmem:[%s1037_s7 + $0x80] sm:$0xff]  ;;  %218 = vst [vmem:[%s1045_s8 + $0x30] sm:$0xff] %v217_v6  ;;  %220 = vst [vmem:[%s1045_s8 + $0x38] sm:$0xff] %v219_v7  ;;  %v223_v9 = vld [vmem:[%s1037_s7 + $0x88] sm:$0xff] }
  0x17   : > { %222 = vst [vmem:[%s1045_s8 + $0x40] sm:$0xff] %v221_v8  ;;  %v225_v10 = vld [vmem:[%s1037_s7 + $0xa0] sm:$0xff]  ;;  %v227_v11 = vld [vmem:[%s1037_s7 + $0xa8] sm:$0xff]  ;;  %224 = vst [vmem:[%s1045_s8 + $0x48] sm:$0xff] %v223_v9 }
  0x18   : > { %226 = vst [vmem:[%s1045_s8 + $0x50] sm:$0xff] %v225_v10  ;;  %228 = vst [vmem:[%s1045_s8 + $0x58] sm:$0xff] %v227_v11  ;;  %v229_v12 = vld [vmem:[%s1037_s7 + $0xc0] sm:$0xff]  ;;  %v231_v13 = vld [vmem:[%s1037_s7 + $0xc8] sm:$0xff] }
  0x19   : > { %v233_v14 = vld [vmem:[%s1037_s7 + $0xe0] sm:$0xff]  ;;  %230 = vst [vmem:[%s1045_s8 + $0x60] sm:$0xff] %v229_v12  ;;  %232 = vst [vmem:[%s1045_s8 + $0x68] sm:$0xff] %v231_v13  ;;  %v235_v15 = vld [vmem:[%s1037_s7 + $0xe8] sm:$0xff] }
  0x1a   : > { %234 = vst [vmem:[%s1045_s8 + $0x70] sm:$0xff] %v233_v14  ;;  %v237_v16 = vld [vmem:[%s1037_s7 + $0x100] sm:$0xff]  ;;  %v239_v17 = vld [vmem:[%s1037_s7 + $0x108] sm:$0xff]  ;;  %236 = vst [vmem:[%s1045_s8 + $0x78] sm:$0xff] %v235_v15 }
  0x1b   : > { %238 = vst [vmem:[%s1045_s8 + $0x80] sm:$0xff] %v237_v16  ;;  %240 = vst [vmem:[%s1045_s8 + $0x88] sm:$0xff] %v239_v17  ;;  %v241_v18 = vld [vmem:[%s1037_s7 + $0x120] sm:$0xff]  ;;  %v243_v19 = vld [vmem:[%s1037_s7 + $0x128] sm:$0xff] }
  0x1c   : > { %v245_v20 = vld [vmem:[%s1037_s7 + $0x140] sm:$0xff]  ;;  %242 = vst [vmem:[%s1045_s8 + $0x90] sm:$0xff] %v241_v18  ;;  %244 = vst [vmem:[%s1045_s8 + $0x98] sm:$0xff] %v243_v19  ;;  %v247_v21 = vld [vmem:[%s1037_s7 + $0x148] sm:$0xff] }
  0x1d   : > { %246 = vst [vmem:[%s1045_s8 + $0xa0] sm:$0xff] %v245_v20  ;;  %v249_v22 = vld [vmem:[%s1037_s7 + $0x160] sm:$0xff]  ;;  %v251_v23 = vld [vmem:[%s1037_s7 + $0x168] sm:$0xff]  ;;  %248 = vst [vmem:[%s1045_s8 + $0xa8] sm:$0xff] %v247_v21 }
  0x1e   : > { %250 = vst [vmem:[%s1045_s8 + $0xb0] sm:$0xff] %v249_v22  ;;  %252 = vst [vmem:[%s1045_s8 + $0xb8] sm:$0xff] %v251_v23  ;;  %v253_v24 = vld [vmem:[%s1037_s7 + $0x180] sm:$0xff]  ;;  %v255_v25 = vld [vmem:[%s1037_s7 + $0x188] sm:$0xff] }
  0x1f   : > { %v257_v26 = vld [vmem:[%s1037_s7 + $0x1a0] sm:$0xff]  ;;  %254 = vst [vmem:[%s1045_s8 + $0xc0] sm:$0xff] %v253_v24  ;;  %256 = vst [vmem:[%s1045_s8 + $0xc8] sm:$0xff] %v255_v25  ;;  %v259_v27 = vld [vmem:[%s1037_s7 + $0x1a8] sm:$0xff] }
  0x20   : > { %258 = vst [vmem:[%s1045_s8 + $0xd0] sm:$0xff] %v257_v26  ;;  %v261_v28 = vld [vmem:[%s1037_s7 + $0x1c0] sm:$0xff]  ;;  %v263_v29 = vld [vmem:[%s1037_s7 + $0x1c8] sm:$0xff]  ;;  %260 = vst [vmem:[%s1045_s8 + $0xd8] sm:$0xff] %v259_v27 }
  0x21   : > { %262 = vst [vmem:[%s1045_s8 + $0xe0] sm:$0xff] %v261_v28  ;;  %264 = vst [vmem:[%s1045_s8 + $0xe8] sm:$0xff] %v263_v29 }
  0x22 PF: > { %p863_p7 = scmp.ge.s32.totalorder %s962_s20, 1  ;;  %p269_p8 = scmp.lt.s32.totalorder %s962_s20, 3 }
  0x24   : > { %p270_p9 = pnand %p863_p7, %p269_p8 }
  0x25   : > { %s276_s9 = sand.u32 (!%p270_p9), 1, %s954_s18   ;;  %p312_p10 = scmp.lt.s32.totalorder (!%p270_p9), %s1012_s21, 1 }
  0x26   : > { %273 = sbr.rel (%p270_p9) target bundleno = 412 (0x19c), region = 51 }
  0x27   : > { %s910_s10 = smul.u32 (!%p270_p9), 240, %s276_s9 }
  0x28   : > { %s911_s30 = smul.u32 (!%p270_p9), 48, %s276_s9 }
  0x29   : > { %s1112_s15 = scalar_lea.vmem (!%p270_p9), [#allocation2], %s910_s10 }
  0x2a   : > { %s1167_s6 = scalar_lea.vmem (!%p270_p9), [#allocation3], %s911_s30 }
  0x2b   : > { %v964_v30 = vmov 0.0   ;;  %v331_v31 = vld [vmem:[%s1213_s2] sm:$0xff]  ;;  %vm341_vm0 = vcmask 1043456   ;;  %v965_v32 = vmov 0   ;;  %v897_v33 = vld [vmem:[%s1213_s2 + $0x10] sm:$0xff]  ;;  %v328_v38 = vld [vmem:[%s1112_s15 + $0x38] sm:$0xff] }
  0x2c   : > { %412 = vmatprep.mubr.f32.mxu0 %v964_v30  ;;  %541 = vmatprep.mubr.f32.mxu1 %v964_v30  ;;  %v330_v34 = vld [vmem:[%s1112_s15 + $0x48] sm:$0xf]  ;;  %v879_v35 = vld [vmem:[%s1112_s15 + $0x98] sm:$0xf]  ;;  %v329_v36 = vld [vmem:[%s1112_s15 + $0x40] sm:$0xf] }
  0x2d   : > { %938 = vset.pattern.permute.xlu0 %v965_v32  ;;  %939 = vset.pattern.permute.xlu1 %v965_v32  ;;  %v878_v37 = vld [vmem:[%s1112_s15 + $0x90] sm:$0xf]  ;;  %v877_v39 = vld [vmem:[%s1112_s15 + $0x88] sm:$0xff]  ;;  %v876_v41 = vld [vmem:[%s1112_s15 + $0x80] sm:$0xff]  ;;  %vm337_vm1 = vcmask 293888   ;;  %s313_s18 = scalar_select %p312_p10, %s1012_s21, 1 }
  0x2e   : > { %334 = vperm.xlu0 %938, %v331_v31   ;;  %592 = vperm.xlu1 %939, %v897_v33   ;;  %v327_v40 = vld [vmem:[%s1112_s15 + $0x30] sm:$0xff]  ;;  %v326_v42 = vld [vmem:[%s1112_s15 + $0x28] sm:$0xff]  ;;  %v875_v43 = vld [vmem:[%s1112_s15 + $0x78] sm:$0xff]  ;;  %vm434_vm2 = vcmask 57344   ;;  %s908_s14 = sshll.u32 (%p1027_p5), %s1012_s21, 4 }
  0x2f   : > { %866 = vmatprep.subr.msk.mxu0 %vm341_vm0, %v330_v34  ;;  %881 = vmatprep.subr.msk.mxu1 %vm341_vm0, %v879_v35  ;;  %v325_v44 = vld [vmem:[%s1112_s15 + $0x20] sm:$0xff]  ;;  %v874_v45 = vld [vmem:[%s1112_s15 + $0x70] sm:$0xff]  ;;  %v324_v46 = vld [vmem:[%s1112_s15 + $0x18] sm:$0xff]  ;;  %s864_s7 = sshll.u32 %s313_s18, 2  ;;  %s719_s17 = scalar_lea.vmem (%p1027_p5), %s1214_s3, %s908_s14 }
  0x30   : > { %867 = vmatpush1.msk.msra.mxu0 %vm341_vm0, %v329_v36  ;;  %882 = vmatpush1.msk.msra.mxu1 %vm341_vm0, %v878_v37  ;;  %v873_v47 = vld [vmem:[%s1112_s15 + $0x68] sm:$0xff]  ;;  %v323_v48 = vld [vmem:[%s1112_s15 + $0x10] sm:$0xff]  ;;  %v872_v49 = vld [vmem:[%s1112_s15 + $0x60] sm:$0xff]  ;;  %v427_v37 = vlaneseq  ;;  %s315_s10 = scalar_lea.vmem %s1215_s4, %s864_s7  ;;  %s319_s13 = scalar_lea.vmem %s1216_s5, %s864_s7 }
  0x31   : > { %372 = vmatprep.subr.mxu0 %v328_v38  ;;  %501 = vmatprep.subr.mxu1 %v877_v39  ;;  %v322_v50 = vld [vmem:[%s1112_s15 + $0x8] sm:$0xff]  ;;  %v871_v51 = vld [vmem:[%s1112_s15 + $0x58] sm:$0xff]  ;;  %v321_v52 = vld [vmem:[%s1112_s15] sm:$0xff] }
  0x32   : > { %373 = vmatpush1.msra.mxu0 %v327_v40  ;;  %502 = vmatpush1.msra.mxu1 %v876_v41  ;;  %v870_v53 = vld [vmem:[%s1112_s15 + $0x50] sm:$0xff]  ;;  %v869_v55 = vld [vmem:[%s1212_s1 + $0x8] sm:$0xff]  ;;  %v895_v57 = vld [vmem:[%s1112_s15 + $0xe0] sm:$0xf]  ;;  %v428_v38 = vand.u32 127, %v427_v37  ;;  %v430_v39 = vshrl.u32 %v427_v37, 7 }
  0x33   : > { %374 = vmatprep.subr.mxu0 %v326_v42  ;;  %503 = vmatprep.subr.mxu1 %v875_v43  ;;  %v320_v54 = vld [vmem:[%s1212_s1] sm:$0xff]  ;;  %v896_v56 = vld [vmem:[%s1112_s15 + $0xe8] sm:$0xf]  ;;  %v894_v59 = vld [vmem:[%s1112_s15 + $0xd8] sm:$0xff] }
  0x34   : > { %375 = vmatpush1.msra.mxu0 %v325_v44  ;;  %504 = vmatpush1.msra.mxu1 %v874_v45  ;;  %v880_v58 = vld [vmem:[%s1213_s2 + $0x8] sm:$0xff]  ;;  %v893_v60 = vld [vmem:[%s1112_s15 + $0xd0] sm:$0xff]  ;;  %v891_v62 = vld [vmem:[%s1112_s15 + $0xc0] sm:$0xff]  ;;  %v431_v40 = vsub.s32 %v428_v38, %v430_v39 }
  0x35   : > { %376 = vmatprep.subr.mxu0 %v324_v46  ;;  %505 = vmatprep.subr.mxu1 %v873_v47  ;;  %v892_v61 = vld [vmem:[%s1112_s15 + $0xc8] sm:$0xff]  ;;  %v890_v63 = vld [vmem:[%s1112_s15 + $0xb8] sm:$0xff]  ;;  %v889_v0 = vld [vmem:[%s1112_s15 + $0xb0] sm:$0xff] }
  0x36   : > { %377 = vmatpush1.msra.mxu0 %v323_v48  ;;  %506 = vmatpush1.msra.mxu1 %v872_v49  ;;  %v888_v1 = vld [vmem:[%s1112_s15 + $0xa8] sm:$0xff]  ;;  %v887_v2 = vld [vmem:[%s1112_s15 + $0xa0] sm:$0xff] }
  0x37   : > { %378 = vmatprep.subr.mxu0 %v322_v50  ;;  %507 = vmatprep.subr.mxu1 %v871_v51  ;;  %v886_v3 = vld [vmem:[%s1212_s1 + $0x10] sm:$0xff] }
  0x38   : > { %379 = vmatpush1.msra.mxu0 %v321_v52  ;;  %508 = vmatpush1.msra.mxu1 %v870_v53 }
  0x39   : > { %868 = vmatmul.mubr.msk.f32.vlgmr.msra.gmra.mxu0 %vm337_vm1, %v320_v54  ;;  %883 = vmatmul.mubr.msk.f32.vlgmr.msra.gmra.mxu1 %vm337_vm1, %v869_v55 }
  0x3a   : > { %898 = vmatprep.subr.msk.mxu0 %vm341_vm0, %v896_v56  ;;  %668 = vmatprep.mubr.f32.mxu0 %v964_v30 }
  0x3b   : > { %899 = vmatpush1.msk.msra.mxu0 %vm341_vm0, %v895_v57  ;;  %465 = vperm.xlu0 %938, %v880_v58  }
  0x3c   : > { %628 = vmatprep.subr.mxu0 %v894_v59 }
  0x3d   : > { %629 = vmatpush1.msra.mxu0 %v893_v60 }
  0x3e   : > { %630 = vmatprep.subr.mxu0 %v892_v61 }
  0x3f   : > { %631 = vmatpush1.msra.mxu0 %v891_v62 }
  0x40   : > { %632 = vmatprep.subr.mxu0 %v890_v63 }
  0x41   : > { %633 = vmatpush1.msra.mxu0 %v889_v0 }
  0x42   : > { %634 = vmatprep.subr.mxu0 %v888_v1 }
  0x43   : > { %635 = vmatpush1.msra.mxu0 %v887_v2 }
  0x44   : > { %900 = vmatmul.mubr.msk.f32.vlgmr.msra.gmra.mxu0 %vm337_vm1, %v886_v3 }
  0xa9   : > { %v335_v4 = vpop.permute.xlu0 %334  ;;  %v593_v24 = vpop.permute.xlu1 %592 }
  0xb6   : > { %v466_v5 = vpop.permute.xlu0 %465 }
  0xf9   : > { %v414_v6 = vpop.f32.mrf.mxu0  ;;  %v543_v7 = vpop.f32.mrf.mxu1 }
  0xfa   : > { %v415_v8 = vadd.f32 %v414_v6, %v335_v4  ;;  %v544_v9 = vadd.f32 %v543_v7, %v466_v5 }
  0xfb   : > { %v416_v10 = vpop.f32.mrf.mxu0  ;;  %v545_v11 = vpop.f32.mrf.mxu1 }
  0xfc   : > { %v419_v12 = vmax.f32 %v415_v8, 0.0  ;;  %v548_v13 = vmax.f32 %v544_v9, 0.0  ;;  %v417_v14 = vadd.f32 %v416_v10, %v335_v4  ;;  %v546_v15 = vadd.f32 %v545_v11, %v466_v5 }
  0xfe   : > { %421 = vst [vmem:[%s1167_s6] sm:$0xff] %v419_v12  ;;  %884 = vst [vmem:[%s1167_s6 + $0x10] sm:$0xff] %v548_v13  ;;  %v420_v16 = vmax.f32 %v417_v14, 0.0  ;;  %v549_v17 = vmax.f32 %v546_v15, 0.0  ;;  %v436_v18 = vmul.f32 %v419_v12, %v419_v12  ;;  %v563_v19 = vmul.f32 %v548_v13, %v548_v13 }
 0x100   : > { %422 = vst [vmem:[%s1167_s6 + $0x8] sm:$0xff] %v420_v16  ;;  %885 = vst [vmem:[%s1167_s6 + $0x18] sm:$0xff] %v549_v17  ;;  %v553_v20 = vadd.f32 %v549_v17, %v548_v13  ;;  %v423_v21 = vadd.f32 %v420_v16, %v419_v12  ;;  %v437_v22 = vmul.f32 %v420_v16, %v420_v16 }
 0x101   : > { %v564_v23 = vmul.f32 %v549_v17, %v549_v17 }
 0x102   : > { %554 = vadd.xlane.f32.xlu0 %v553_v20  ;;  %424 = vadd.xlane.f32.xlu1 %v423_v21  ;;  %v438_v26 = vadd.f32 %v437_v22, %v436_v18 }
 0x103   : > { %v565_v27 = vadd.f32 %v564_v23, %v563_v19 }
 0x104   : > { %v670_v25 = vpop.f32.mrf.mxu0 }
 0x105   : > { %v671_v28 = vadd.f32 %v670_v25, %v593_v24  ;;  %v732_v53 = vld [vmem:[%s1167_s6] sm:$0xff] (%p1027_p5)  ;;  %v736_v55 = vld [vmem:[%s1167_s6 + $0x10] sm:$0xff] (%p1027_p5) }
 0x106   : > { %v672_v29 = vpop.f32.mrf.mxu0  ;;  %439 = vadd.xlane.f32.xlu0 %v438_v26  ;;  %566 = vadd.xlane.f32.xlu1 %v565_v27  ;;  %733 = vst [vmem:[%s719_s17] sm:$0xff] (%p1027_p5), %v732_v53  ;;  %737 = vst [vmem:[%s719_s17 + $0x20] sm:$0xff] (%p1027_p5), %v736_v55 }
 0x107   : > { %v675_v30 = vmax.f32 %v671_v28, 0.0  ;;  %v673_v31 = vadd.f32 %v672_v29, %v593_v24  ;;  %v734_v54 = vld [vmem:[%s1167_s6 + $0x8] sm:$0xff] (%p1027_p5)  ;;  %v738_v56 = vld [vmem:[%s1167_s6 + $0x18] sm:$0xff] (%p1027_p5) }
 0x108   : > { %735 = vst [vmem:[%s719_s17 + $0x8] sm:$0xff] (%p1027_p5), %v734_v54  ;;  %739 = vst [vmem:[%s719_s17 + $0x28] sm:$0xff] (%p1027_p5), %v738_v56 }
 0x109   : > { %901 = vst [vmem:[%s1167_s6 + $0x20] sm:$0xff] %v675_v30  ;;  %v676_v32 = vmax.f32 %v673_v31, 0.0  ;;  %v690_v34 = vmul.f32 %v675_v30, %v675_v30 }
 0x10b   : > { %902 = vst [vmem:[%s1167_s6 + $0x28] sm:$0xff] %v676_v32  ;;  %v680_v33 = vadd.f32 %v676_v32, %v675_v30  ;;  %v691_v35 = vmul.f32 %v676_v32, %v676_v32 }
 0x10d   : > { %681 = vadd.xlane.f32.xlu0 %v680_v33  ;;  %v692_v36 = vadd.f32 %v691_v35, %v690_v34 }
 0x10f   : > { %693 = vadd.xlane.f32.xlu1 %v692_v36 }
 0x110   : > { %v740_v57 = vld [vmem:[%s1167_s6 + $0x20] sm:$0xff] (%p1027_p5) }
 0x111   : > { %741 = vst [vmem:[%s719_s17 + $0x40] sm:$0xff] (%p1027_p5), %v740_v57 }
 0x112   : > { %v742_v58 = vld [vmem:[%s1167_s6 + $0x28] sm:$0xff] (%p1027_p5) }
 0x113   : > { %743 = vst [vmem:[%s719_s17 + $0x48] sm:$0xff] (%p1027_p5), %v742_v58 }
 0x18b   : > { %v555_v41 = vpop.xlane.xlu0 %554  ;;  %v425_v42 = vpop.xlane.xlu1 %424 }
 0x18c   : > { %v560_v43 = vrot.slane %v555_v41, %v431_v40  ;;  %v432_v44 = vrot.slane %v425_v42, %v431_v40 }
 0x18e   : > { %562 = vst.msk [vmem:[%s315_s10 + $0x1] sm:$0x1] %vm434_vm2, %v560_v43  ;;  %435 = vst.msk [vmem:[%s315_s10] sm:$0x1] %vm434_vm2, %v432_v44 }
 0x18f   : > { %v440_v45 = vpop.xlane.xlu0 %439  ;;  %v567_v46 = vpop.xlane.xlu1 %566 }
 0x190   : > { %v445_v47 = vrot.slane %v440_v45, %v431_v40  ;;  %v572_v48 = vrot.slane %v567_v46, %v431_v40 }
 0x192   : > { %447 = vst.msk [vmem:[%s319_s13] sm:$0x1] %vm434_vm2, %v445_v47  ;;  %574 = vst.msk [vmem:[%s319_s13 + $0x1] sm:$0x1] %vm434_vm2, %v572_v48 }
 0x196   : > { %v682_v49 = vpop.xlane.xlu0 %681 }
 0x197   : > { %v687_v50 = vrot.slane %v682_v49, %v431_v40  ;;  %716 = sbr.rel (!%p1027_p5) target bundleno = 412 (0x19c), region = 59 }
 0x198   : > { %v694_v51 = vpop.xlane.xlu1 %693 }
 0x199   : > { %689 = vst.msk [vmem:[%s315_s10 + $0x2] sm:$0x1] %vm434_vm2, %v687_v50  ;;  %v699_v52 = vrot.slane %v694_v51, %v431_v40 }
 0x19b   : > { %701 = vst.msk [vmem:[%s319_s13 + $0x2] sm:$0x1] %vm434_vm2, %v699_v52 }
 0x19c PF: > { %p13_p11 = scmp.ge.s32.totalorder %s1015_s22, 4   ;;  %s1218_s18 = smov %s958_s19 }
 0x19d   : > { %s1219_s19 = smov %s1025_s25  ;;  %s1220_s20 = smov %s1015_s22 }
 0x19e   :  { %15 = sbr.rel (!%p13_p11) target bundleno = 2 (0x2), region = 145 }

</bundles_post_ra>
